<compile_context>
chip_gen: v6e
topology: v6e:2x2x1
jax: 0.10.0
libtpu: 0.0.40
codegen_flags: <defaults>
</compile_context>

<pallas_src>
import jax
import jax.numpy as jnp
from jax import lax
from jax.experimental import pallas as pl
from jax.experimental.pallas import tpu as pltpu

_EPS = 1e-07
_VMEM_LIMIT_BYTES = 32 * 1024 * 1024      # explicit scoped-VMEM budget (all gens)
_TARGET_BLOCK_BYTES = 1 * 1024 * 1024     # ~1 MiB blocks pipeline well
_MAX_BLOCK_BYTES = 4 * 1024 * 1024        # 4 bufs x 4 MiB = 16 MiB < VMEM limit


def _make_single_pass_kernel(n_true, n_pad):
    """(TILE_C, n_pad) block: whole spatial row per channel, full norm in one shot."""
    need_mask = n_pad != n_true

    def kernel(x_ref, o_ref):
        x = x_ref[...]                       # native dtype; no full-tile f32 copy
        # Per-channel mean, f32 accumulation (zero padding contributes nothing).
        s = jnp.sum(x, axis=1, keepdims=True, dtype=jnp.float32)
        mean = s * jnp.float32(1.0 / n_true)
        diff = x - mean.astype(x.dtype)
        d2 = diff * diff
        if need_mask:                        # exclude lane padding from the variance
            lane = lax.broadcasted_iota(jnp.int32, d2.shape, 1)
            d2 = jnp.where(lane < n_true, d2, jnp.zeros_like(d2))
        ssq = jnp.sum(d2, axis=1, keepdims=True, dtype=jnp.float32)
        var = ssq / jnp.float32(n_true - 1)  # unbiased (N-1), matches torch.std
        # Hoisted reciprocal: TILE_C reciprocals instead of a TILE_C*HW divide.
        inv = pl.reciprocal(jnp.sqrt(var) + jnp.float32(_EPS), approx=False)
        o_ref[...] = (diff * inv.astype(x.dtype)).astype(o_ref.dtype)

    return kernel


def _make_stats_kernel(n_true, tile_hw, need_mask):
    """Pass 1 of the large-HW fallback: per-channel sum and sum of squares."""

    def kernel(x_ref, sum_ref, sq_ref):
        j = pl.program_id(1)

        @pl.when(j == 0)
        def _init():
            sum_ref[...] = jnp.zeros_like(sum_ref)
            sq_ref[...] = jnp.zeros_like(sq_ref)

        x = x_ref[...]
        if need_mask:                        # zero out-of-range lanes of the last tile
            lane = lax.broadcasted_iota(jnp.int32, x.shape, 1) + j * tile_hw
            x = jnp.where(lane < n_true, x, jnp.zeros_like(x))
        sum_ref[...] += jnp.sum(x, axis=1, keepdims=True, dtype=jnp.float32)
        sq_ref[...] += jnp.sum(x * x, axis=1, keepdims=True, dtype=jnp.float32)

    return kernel


def _apply_kernel(x_ref, mean_ref, inv_ref, o_ref):
    """Pass 2 of the large-HW fallback: (x - mean) * inv_std."""
    x = x_ref[...]
    mean = mean_ref[...].astype(x.dtype)
    inv = inv_ref[...].astype(x.dtype)
    o_ref[...] = ((x - mean) * inv).astype(o_ref.dtype)


def norm_layer(x, *, max_block_bytes=_MAX_BLOCK_BYTES):
    """x: (1, C, H, W). Per-channel normalization; same shape and dtype."""
    b, c, h, w = x.shape
    assert b == 1, "normLayer requires batch size 1"
    hw = h * w
    itemsize = jnp.dtype(x.dtype).itemsize

    # Lane-dense layout: pad the flattened spatial axis to a multiple of 128.
    hw_pad = ((hw + 127) // 128) * 128
    x2d = x.reshape(c, hw)
    if hw_pad != hw:
        x2d = jnp.pad(x2d, ((0, 0), (0, hw_pad - hw)))

    target = min(_TARGET_BLOCK_BYTES, max_block_bytes)
    min_rows = c if c <= 8 else 8
    single_pass = min_rows * hw_pad * itemsize <= max_block_bytes

    if single_pass:
        # ---------------- fast path: channel-tiled, whole HW row per block ----
        if c <= 8:
            tile_c = c                       # block dim == full array dim (legal)
        else:
            rows = max(1, target // (hw_pad * itemsize))
            tile_c = min(c, max(8, (rows // 8) * 8))
            if tile_c < c:
                tile_c = (tile_c // 8) * 8   # sublane dim multiple of 8
        out2d = pl.pallas_call(
            _make_single_pass_kernel(hw, hw_pad),
            out_shape=jax.ShapeDtypeStruct((c, hw_pad), x.dtype),
            grid=(pl.cdiv(c, tile_c),),
            in_specs=[pl.BlockSpec((tile_c, hw_pad), lambda i: (i, 0))],
            out_specs=pl.BlockSpec((tile_c, hw_pad), lambda i: (i, 0)),
            input_output_aliases={0: 0},
            compiler_params=pltpu.CompilerParams(
                dimension_semantics=("parallel",),
                vmem_limit_bytes=_VMEM_LIMIT_BYTES),
        )(x2d)
    else:
        # -------- large-HW fallback: two passes, both spatially tiled ---------
        tile_c = c if c <= 8 else 8
        lanes = max(1, target // (tile_c * itemsize))
        tile_hw = int(min(hw_pad, max(128, (lanes // 128) * 128)))
        need_mask = (hw % tile_hw) != 0
        grid = (pl.cdiv(c, tile_c), pl.cdiv(hw_pad, tile_hw))

        s, sq = pl.pallas_call(
            _make_stats_kernel(hw, tile_hw, need_mask),
            out_shape=(jax.ShapeDtypeStruct((c, 1), jnp.float32),
                       jax.ShapeDtypeStruct((c, 1), jnp.float32)),
            grid=grid,
            in_specs=[pl.BlockSpec((tile_c, tile_hw), lambda i, j: (i, j))],
            out_specs=(pl.BlockSpec((tile_c, 1), lambda i, j: (i, 0)),
                       pl.BlockSpec((tile_c, 1), lambda i, j: (i, 0))),
            compiler_params=pltpu.CompilerParams(
                dimension_semantics=("parallel", "arbitrary"),
                vmem_limit_bytes=_VMEM_LIMIT_BYTES),
        )(x2d)

        # Tiny (C, 1) math between passes: mean, unbiased var, 1/(std + eps).
        mean = s / jnp.float32(hw)
        var = jnp.maximum(sq - s * mean, 0.0) / jnp.float32(hw - 1)
        inv = 1.0 / (jnp.sqrt(var) + jnp.float32(_EPS))

        out2d = pl.pallas_call(
            _apply_kernel,
            out_shape=jax.ShapeDtypeStruct((c, hw_pad), x.dtype),
            grid=grid,
            in_specs=[pl.BlockSpec((tile_c, tile_hw), lambda i, j: (i, j)),
                      pl.BlockSpec((tile_c, 1), lambda i, j: (i, 0)),
                      pl.BlockSpec((tile_c, 1), lambda i, j: (i, 0))],
            out_specs=pl.BlockSpec((tile_c, tile_hw), lambda i, j: (i, j)),
            input_output_aliases={0: 0},
            compiler_params=pltpu.CompilerParams(
                dimension_semantics=("parallel", "parallel"),
                vmem_limit_bytes=_VMEM_LIMIT_BYTES),
        )(x2d, mean, inv)

    if hw_pad != hw:
        out2d = out2d[:, :hw]
    return out2d.reshape(1, c, h, w)


def _reference(x):
    # Pure-JAX reference mirroring the PyTorch forward (unbiased std).
    b, c, h, w = x.shape
    xf = x.reshape(c, -1).astype(jnp.float32)
    mean = xf.mean(-1)
    var = jnp.sum((xf - mean[:, None]) ** 2, axis=-1) / (h * w - 1)
    std = jnp.sqrt(var)
    out = (x.astype(jnp.float32) - mean.reshape(1, c, 1, 1)) / (
        std + _EPS).reshape(1, c, 1, 1)
    return out.astype(x.dtype)


if __name__ == "__main__":
    key = jax.random.PRNGKey(0)
    k1, k2 = jax.random.split(key)

    # Primary test (batch must be 1 per the module's assert).
    x = jax.random.normal(k1, (1, 4, 16, 16), dtype=jnp.float32) * 3.0 + 1.5
    out = norm_layer(x)
    jax.block_until_ready(out)
    assert out.shape == x.shape and out.dtype == x.dtype
    assert jnp.allclose(out, _reference(x), atol=1e-5, rtol=1e-5), "single-pass mismatch"

    # Exercise the lane-padding path (HW not a multiple of 128).
    x2 = jax.random.normal(k2, (1, 3, 10, 10), dtype=jnp.float32) * 2.0 - 0.5
    out2 = norm_layer(x2)
    jax.block_until_ready(out2)
    assert jnp.allclose(out2, _reference(x2), atol=1e-5, rtol=1e-5), "padded-path mismatch"

    # Exercise the two-pass large-HW fallback by shrinking the block budget.
    x3 = jax.random.normal(k1, (1, 5, 20, 20), dtype=jnp.float32) * 3.0 + 1.5
    out3 = norm_layer(x3, max_block_bytes=1024)
    jax.block_until_ready(out3)
    # Two-pass uses the sum / sum-of-squares form -> slightly looser tolerance.
    assert jnp.allclose(out3, _reference(x3), atol=1e-4, rtol=1e-4), "two-pass mismatch"

    print("KERNEL_OK")
</pallas_src>

<mosaic_0001>
module attributes {stable_mosaic.version = 11 : i64} {
  func.func @kernel(%arg0: i32, %arg1: memref<4x256xf32, #tpu.memory_space<vmem>>, %arg2: memref<4x256xf32, #tpu.memory_space<vmem>>) attributes {dimension_semantics = [#tpu.dimension_semantics<parallel>], iteration_bounds = array<i64: 1>, scalar_prefetch = 0 : i64, scratch_operands = 0 : i64, tpu.core_type = #tpu.core_type<tc>, window_params = [{transform_indices = @transform_0, window_bounds = array<i64: 4, 256>}, {transform_indices = @transform_1, window_bounds = array<i64: 4, 256>}]} {
    %c0 = arith.constant 0 : index
    %c0_0 = arith.constant 0 : index
    %0 = vector.load %arg1[%c0, %c0_0] : memref<4x256xf32, #tpu.memory_space<vmem>>, vector<4x256xf32>
    %cst = arith.constant dense<0.000000e+00> : vector<4xf32>
    %1 = vector.multi_reduction <add>, %0, %cst [1] : vector<4x256xf32> to vector<4xf32>
    %2 = vector.shape_cast %1 : vector<4xf32> to vector<4x1xf32>
    %cst_1 = arith.constant 3.906250e-03 : f32
    %3 = vector.broadcast %cst_1 : f32 to vector<4x1xf32>
    %4 = arith.mulf %2, %3 : vector<4x1xf32>
    %5 = vector.broadcast %4 : vector<4x1xf32> to vector<4x256xf32>
    %6 = arith.subf %0, %5 : vector<4x256xf32>
    %7 = arith.mulf %6, %6 : vector<4x256xf32>
    %cst_2 = arith.constant dense<0.000000e+00> : vector<4xf32>
    %8 = vector.multi_reduction <add>, %7, %cst_2 [1] : vector<4x256xf32> to vector<4xf32>
    %9 = vector.shape_cast %8 : vector<4xf32> to vector<4x1xf32>
    %cst_3 = arith.constant 2.550000e+02 : f32
    %10 = vector.broadcast %cst_3 : f32 to vector<4x1xf32>
    %11 = arith.divf %9, %10 : vector<4x1xf32>
    %12 = math.sqrt %11 : vector<4x1xf32>
    %cst_4 = arith.constant 1.000000e-07 : f32
    %13 = vector.broadcast %cst_4 : f32 to vector<4x1xf32>
    %14 = arith.addf %12, %13 : vector<4x1xf32>
    %15 = tpu.reciprocal %14 : vector<4x1xf32> -> vector<4x1xf32>
    %16 = vector.broadcast %15 : vector<4x1xf32> to vector<4x256xf32>
    %17 = arith.mulf %6, %16 : vector<4x256xf32>
    %c0_5 = arith.constant 0 : index
    %c0_6 = arith.constant 0 : index
    %18 = vector.load %arg2[%c0_5, %c0_6] : memref<4x256xf32, #tpu.memory_space<vmem>>, vector<4x256xf32>
    tpu.vector_store %arg2[%c0_5, %c0_6], %17 {strides = array<i32>} : memref<4x256xf32, #tpu.memory_space<vmem>>, vector<4x256xf32>,
    return
  }
  func.func @transform_0(%arg0: i32) -> (i32, i32) {
    %c0_i32 = arith.constant 0 : i32
    %c0_i32_0 = arith.constant 0 : i32
    return %arg0, %c0_i32 : i32, i32
  }
  func.func @transform_1(%arg0: i32) -> (i32, i32) {
    %c0_i32 = arith.constant 0 : i32
    %c0_i32_0 = arith.constant 0 : i32
    return %arg0, %c0_i32 : i32, i32
  }
}

</mosaic_0001>

<bundles_post_ra>
// kernel: tpu_custom_call.1
= control target key start
LH: loop header
LB: loop body
LE: loop exit
PB: predicated region body
PF: predicated region fallthrough
CT: control target
= control target key end

     0   :  { %6 = vsyncpa [#allocation3], 0  ;;  %s163_s0 = inlined_call_operand.hbm [shape: f32[4,256], index: 0, kind: input, shape index: {}, may-alias: {0,1}]   ;;  %s164_s1 = inlined_call_operand.hbm [shape: f32[4,256], index: 1, kind: output, shape index: {}, may-alias: {0,1}]  }
   0x1   :  { %7 = vsyncpa [#allocation4], 0  ;;  %s140_s6 = smov [#allocation2]  }
   0x2   :  { %s14_s7 = sshll.u32 %s140_s6, 4  ;;  %s15_s7 = int_to_ptr.vmem [resolvable:$true] %s14_s7 }
   0x3   :  { %s104_s8 = scalar_lea.vmem %s15_s7, 128  ;;  %p109_p1 = scmp.lt.s32.totalorder %s15_s7, %s15_s7 }
   0x4   :  { %p105_p0 = scmp.ne.s32.totalorder %s15_s7, %s104_s8  ;;  %p110_p2 = scmp.lt.s32.totalorder %s104_s8, %s104_s8 }
   0x6   :  { %p111_p3 = por %p110_p2, %p109_p1 }
   0x8   :  { %p112_p4 = pnand %p111_p3, %p105_p0 }
   0xa   :  { %115 = shalt.err (!%p112_p4)
}
   0xb   :  { %17 = dma.hbm_to_vmem [thread:$0]  %s163_s0, 128, %s15_s7, [#allocation3]  }
   0xc   :  { %136 = dma.done.wait [#allocation3], 128  }
   0xd   :  { %137 = vsyncadd [#allocation3], 4294967168  ;;  %vm25_vm0 = vcmask 1043456   ;;  %v21_v0 = vld [vmem:[#allocation2] sm:$0xff]  ;;  %v141_v5 = vmov 839922192   ;;  %v36_v7 = vlaneseq }
   0xe   :  { %v23_v1 = vcombine.high %v21_v0, %v21_v0  ;;  %v26_v2 = vsel %vm25_vm0, %v21_v0, 0.0  ;;  %v34_v6 = vunpack.c.l.s4 %v141_v5  ;;  %s142_s0 = smov [#allocation5]  }
   0xf   :  { %v37_v9 = vshrl.u32 %v36_v7, 7  ;;  %s79_s11 = sshll.u32 %s142_s0, 4  ;;  %s80_s11 = int_to_ptr.vmem [resolvable:$true] %s79_s11 }
  0x10   :  { %v27_v3 = vsel %vm25_vm0, %v23_v1, 0.0  ;;  %v35_v8 = vunpack.c.0.s8 %v34_v6  ;;  %s116_s12 = scalar_lea.vmem %s80_s11, 128  ;;  %p121_p6 = scmp.lt.s32.totalorder %s80_s11, %s80_s11 }
  0x11   :  { %v28_v4 = vadd.f32 %v27_v3, %v26_v2  ;;  %p117_p5 = scmp.ne.s32.totalorder %s80_s11, %s116_s12  ;;  %p122_p7 = scmp.lt.s32.totalorder %s116_s12, %s116_s12 }
  0x12   :  { %v38_v10 = vsub.s32 %v35_v8, %v37_v9 }
  0x13   :  { %29 = vadd.xlane.f32.xlu0 %v28_v4  ;;  %p123_p8 = por %p122_p7, %p121_p6 }
  0x15   :  { %p124_p9 = pnand %p123_p8, %p117_p5 }
  0x9c   :  { %v30_v11 = vpop.xlane.xlu0 %29 }
  0x9d   :  { %v31_v12 = vmul.f32 0.00390625, %v30_v11 }
  0x9f   :  { %v39_v13 = vrot.slane %v31_v12, %v38_v10 }
  0xa1   :  { %v41_v14 = vsub.f32 %v21_v0, %v39_v13 }
  0xa3   :  { %v42_v15 = vmul.f32 %v41_v14, %v41_v14 }
  0xa5   :  { %v44_v16 = vcombine.high %v42_v15, %v42_v15  ;;  %v46_v17 = vsel %vm25_vm0, %v42_v15, 0.0 }
  0xa7   :  { %v47_v18 = vsel %vm25_vm0, %v44_v16, 0.0 }
  0xa8   :  { %v48_v19 = vadd.f32 %v47_v18, %v46_v17 }
  0xaa   :  { %49 = vadd.xlane.f32.xlu0 %v48_v19 }
 0x133   :  { %v50_v20 = vpop.xlane.xlu0 %49 }
 0x134   :  { %v52_v21 = vmul.f32 0.003921569, %v50_v20 }
 0x136   :  { %92 = vrsqrt.f32 %v52_v21  ;;  %vm55_vm1 = vcmp.eq.f32.partialorder %v52_v21, inf  ;;  %v58_v24 = vand.u32 2147483648, %v52_v21  ;;  %vm57_vm2 = vcmp.eq.f32.partialorder %v52_v21, 0.0 }
 0x143   :  { %v93_v22 = vpop.eup %92 }
 0x144   :  { %v54_v23 = vmul.f32 %v93_v22, %v52_v21 }
 0x146   :  { %v56_v25 = vsel %vm55_vm1, %v52_v21, %v54_v23 }
 0x147   :  { %v59_v26 = vsel %vm57_vm2, %v58_v24, %v56_v25 }
 0x148   :  { %v60_v27 = vadd.f32 1e-07, %v59_v26 }
 0x14a   :  { %94 = vrcp.f32 %v60_v27 }
 0x157   :  { %v95_v28 = vpop.eup %94 }
 0x158   :  { %v69_v29 = vrot.slane %v95_v28, %v38_v10 }
 0x15a   :  { %v71_v30 = vmul.f32 %v69_v29, %v41_v14 }
 0x15c   :  { %72 = vst [vmem:[#allocation5] sm:$0xff] %v71_v30 }
 0x15d   :  { %127 = shalt.err (!%p124_p9)
}
 0x15e   :  { %82 = dma.vmem_to_hbm [thread:$0]  %s80_s11, 128, %s164_s1, [#allocation4]  }
 0x15f   :  { %138 = dma.done.wait [#allocation4], 128  }
 0x160   :  { %139 = vsyncadd [#allocation4], 4294967168 }
 0x161   :  { %86 = vsyncpa [#allocation3], 1 }
 0x162   :  { %87 = vsyncpa [#allocation4], 1 }

</bundles_post_ra>
